<compile_context>
chip_gen: v6e
topology: v6e:2x2x1
jax: 0.10.0
libtpu: 0.0.40
codegen_flags: <defaults>
</compile_context>

<pallas_src>
import math

import jax
import jax.numpy as jnp
from jax.experimental import pallas as pl
from jax.experimental.pallas import tpu as pltpu

# ----------------------------- small model config ------------------------------
B = 2                      # batch
C_IN = 3                   # image channels
IMG = 16                   # image H = W
PATCH = 4                  # patch / stride size
NP = (IMG // PATCH) ** 2   # number of patches
S_IMG = NP + 1             # +1 CLS token
D = 64                     # in_planes (ViT width, 768 in the real model)
DP = 32                    # in_planes_proj (512 in the real model)
HEADS = 4
L_IMG = 2                  # transformer depth (12 in the real model)

DT = 32                    # text transformer width (512 in the real model)
S_T = 16                   # text sequence length (77 in the real model)
HEADS_T = 4
L_TXT = 2
N_CTX = 4                  # "A photo of a" context length
N_CLS_CTX = 4              # learnable class context tokens

NUM_CLASSES = 8
CAM_NUM = 3
VIEW_NUM = 2
SIE_COE = 1.0
BN_EPS = 1e-5
LN_EPS = 1e-5

ACT_DTYPE = jnp.bfloat16   # storage dtype inside the CLIP encoders (f32 accumulation in-kernel)
MAX_ROW_TILE = 128         # row tile for [rows, features] slabs (tune >=256 for real dims on v6e)

_PARALLEL_1D = pltpu.CompilerParams(dimension_semantics=("parallel",))
_ARBITRARY_1D = pltpu.CompilerParams(dimension_semantics=("arbitrary",))


# ------------------------------- row tiling helpers -----------------------------
def _row_plan(M):
    """Pick a row tile: (tile_rows, num_tiles, padded_rows)."""
    if M <= MAX_ROW_TILE:
        return M, 1, M                    # full-extent block (allowed for any M)
    n = pl.cdiv(M, MAX_ROW_TILE)
    return MAX_ROW_TILE, n, n * MAX_ROW_TILE


def _pad_rows(x2d, padded_rows):
    M = x2d.shape[0]
    if padded_rows == M:
        return x2d
    return jnp.pad(x2d, ((0, padded_rows - M), (0, 0)))


def _ln_f32(x, g, b):
    mean = jnp.mean(x, axis=-1, keepdims=True)
    var = jnp.mean((x - mean) ** 2, axis=-1, keepdims=True)
    return (x - mean) * jax.lax.rsqrt(var + LN_EPS) * g + b


# ================================ Pallas kernels ================================
def _matmul_kernel(a_ref, w_ref, o_ref):
    # no-bias matmul (patch embed, visual proj, text proj, classifiers)
    acc = jnp.dot(a_ref[...], w_ref[...], preferred_element_type=jnp.float32)
    o_ref[...] = acc.astype(o_ref.dtype)


def _matmul_bias_res_kernel(a_ref, w_ref, bias_ref, res_ref, o_ref):
    # attention out-projection with fused residual add
    acc = jnp.dot(a_ref[...], w_ref[...], preferred_element_type=jnp.float32)
    acc = acc + bias_ref[...].astype(jnp.float32) + res_ref[...].astype(jnp.float32)
    o_ref[...] = acc.astype(o_ref.dtype)


def _ln_matmul_kernel(x_ref, g_ref, b_ref, w_ref, bias_ref, o_ref):
    # fused LayerNorm -> projection (+bias); LN math in f32, MXU fed in storage dtype
    x = x_ref[...].astype(jnp.float32)
    h = _ln_f32(x, g_ref[...].astype(jnp.float32), b_ref[...].astype(jnp.float32))
    acc = jnp.dot(h.astype(w_ref.dtype), w_ref[...], preferred_element_type=jnp.float32)
    acc = acc + bias_ref[...].astype(jnp.float32)
    o_ref[...] = acc.astype(o_ref.dtype)


def _ln_mlp_res_kernel(x_ref, g_ref, b_ref, w1_ref, b1_ref, w2_ref, b2_ref, o_ref):
    # fused LayerNorm -> fc1 -> QuickGELU -> fc2 -> +residual; the [tm, 4D] intermediate
    # never touches HBM.
    # TODO(synk): for real-model dims (D=768, 4D=3072) tile the 4D reduction of fc2 with a
    # VMEM accumulator instead of holding full fc1/fc2 weights per step.
    x = x_ref[...].astype(jnp.float32)
    h = _ln_f32(x, g_ref[...].astype(jnp.float32), b_ref[...].astype(jnp.float32))
    h1 = jnp.dot(h.astype(w1_ref.dtype), w1_ref[...], preferred_element_type=jnp.float32)
    h1 = h1 + b1_ref[...].astype(jnp.float32)
    h1 = h1 * jax.nn.sigmoid(1.702 * h1)            # QuickGELU (EUP)
    h2 = jnp.dot(h1.astype(w2_ref.dtype), w2_ref[...], preferred_element_type=jnp.float32)
    h2 = h2 + b2_ref[...].astype(jnp.float32)
    o_ref[...] = (x + h2).astype(o_ref.dtype)


def _make_attn_kernel(heads, dh, scale, with_mask):
    dmodel = heads * dh

    def kernel(*refs):
        if with_mask:
            qkv_ref, mask_ref, o_ref = refs
        else:
            qkv_ref, o_ref = refs
            mask_ref = None
        qkv = qkv_ref[...]                                   # [S, 3*D], storage dtype
        outs = []
        for h in range(heads):                               # static per-head slices
            q = qkv[:, h * dh:(h + 1) * dh]
            k = qkv[:, dmodel + h * dh: dmodel + (h + 1) * dh]
            v = qkv[:, 2 * dmodel + h * dh: 2 * dmodel + (h + 1) * dh]
            s = jax.lax.dot_general(q, k, (((1,), (1,)), ((), ())),
                                    preferred_element_type=jnp.float32) * scale
            if with_mask:
                s = s + mask_ref[...].astype(jnp.float32)
            s = s - jnp.max(s, axis=-1, keepdims=True)
            p = jnp.exp(s)
            p = p * pl.reciprocal(jnp.sum(p, axis=-1, keepdims=True), approx=True)
            outs.append(jnp.dot(p.astype(v.dtype), v, preferred_element_type=jnp.float32))
        o_ref[...] = jnp.concatenate(outs, axis=-1).astype(o_ref.dtype)   # lane-dense store

    return kernel


def _layernorm_kernel(x_ref, g_ref, b_ref, o_ref):
    x = x_ref[...].astype(jnp.float32)
    y = _ln_f32(x, g_ref[...].astype(jnp.float32), b_ref[...].astype(jnp.float32))
    o_ref[...] = y.astype(o_ref.dtype)


def _make_bn_kernel(use_batch_stats):
    def kernel(x_ref, g_ref, b_ref, m_ref, v_ref, o_ref):
        x = x_ref[...].astype(jnp.float32)
        if use_batch_stats:                      # nn.BatchNorm1d training behaviour
            mean = jnp.mean(x, axis=0, keepdims=True)
            var = jnp.mean((x - mean) ** 2, axis=0, keepdims=True)
        else:                                    # eval: running statistics
            mean = m_ref[...].astype(jnp.float32)
            var = v_ref[...].astype(jnp.float32)
        y = (x - mean) * jax.lax.rsqrt(var + BN_EPS)
        o_ref[...] = (y * g_ref[...].astype(jnp.float32)
                      + b_ref[...].astype(jnp.float32)).astype(o_ref.dtype)
    return kernel


# ================================ kernel wrappers ===============================
def pallas_matmul(a, w, out_dtype=None):
    """a: [M, K] @ w: [K, N] (no bias)."""
    M, K = a.shape
    N = w.shape[1]
    tm, n, pM = _row_plan(M)
    ap = _pad_rows(a, pM)
    out = pl.pallas_call(
        _matmul_kernel,
        out_shape=jax.ShapeDtypeStruct((pM, N), out_dtype or a.dtype),
        grid=(n,),
        in_specs=[pl.BlockSpec((tm, K), lambda i: (i, 0)),
                  pl.BlockSpec((K, N), lambda i: (0, 0))],
        out_specs=pl.BlockSpec((tm, N), lambda i: (i, 0)),
        compiler_params=_PARALLEL_1D,
    )(ap, w)
    return out[:M]


def pallas_matmul_bias_residual(a, w, bias, residual):
    M, K = a.shape
    N = w.shape[1]
    tm, n, pM = _row_plan(M)
    ap = _pad_rows(a, pM)
    rp = _pad_rows(residual, pM)
    out = pl.pallas_call(
        _matmul_bias_res_kernel,
        out_shape=jax.ShapeDtypeStruct((pM, N), residual.dtype),
        grid=(n,),
        in_specs=[pl.BlockSpec((tm, K), lambda i: (i, 0)),
                  pl.BlockSpec((K, N), lambda i: (0, 0)),
                  pl.BlockSpec((1, N), lambda i: (0, 0)),
                  pl.BlockSpec((tm, N), lambda i: (i, 0))],
        out_specs=pl.BlockSpec((tm, N), lambda i: (i, 0)),
        compiler_params=_PARALLEL_1D,
    )(ap, w, bias.reshape(1, N), rp)
    return out[:M]


def pallas_ln_matmul(x2d, gamma, beta, w, bias):
    M, K = x2d.shape
    N = w.shape[1]
    tm, n, pM = _row_plan(M)
    xp = _pad_rows(x2d, pM)
    out = pl.pallas_call(
        _ln_matmul_kernel,
        out_shape=jax.ShapeDtypeStruct((pM, N), x2d.dtype),
        grid=(n,),
        in_specs=[pl.BlockSpec((tm, K), lambda i: (i, 0)),
                  pl.BlockSpec((1, K), lambda i: (0, 0)),
                  pl.BlockSpec((1, K), lambda i: (0, 0)),
                  pl.BlockSpec((K, N), lambda i: (0, 0)),
                  pl.BlockSpec((1, N), lambda i: (0, 0))],
        out_specs=pl.BlockSpec((tm, N), lambda i: (i, 0)),
        compiler_params=_PARALLEL_1D,
    )(xp, gamma.reshape(1, K), beta.reshape(1, K), w, bias.reshape(1, N))
    return out[:M]


def pallas_ln_mlp_residual(x2d, gamma, beta, w1, b1, w2, b2):
    M, K = x2d.shape
    H = w1.shape[1]
    tm, n, pM = _row_plan(M)
    xp = _pad_rows(x2d, pM)
    out = pl.pallas_call(
        _ln_mlp_res_kernel,
        out_shape=jax.ShapeDtypeStruct((pM, K), x2d.dtype),
        grid=(n,),
        in_specs=[pl.BlockSpec((tm, K), lambda i: (i, 0)),
                  pl.BlockSpec((1, K), lambda i: (0, 0)),
                  pl.BlockSpec((1, K), lambda i: (0, 0)),
                  pl.BlockSpec((K, H), lambda i: (0, 0)),
                  pl.BlockSpec((1, H), lambda i: (0, 0)),
                  pl.BlockSpec((H, K), lambda i: (0, 0)),
                  pl.BlockSpec((1, K), lambda i: (0, 0))],
        out_specs=pl.BlockSpec((tm, K), lambda i: (i, 0)),
        compiler_params=_PARALLEL_1D,
    )(xp, gamma.reshape(1, K), beta.reshape(1, K), w1, b1.reshape(1, H), w2, b2.reshape(1, K))
    return out[:M]


def pallas_attention(qkv, heads, mask=None):
    """qkv: packed [B, S, 3*D] -> [B, S, D]; all heads of a batch element per grid step."""
    Bq, S, three_d = qkv.shape
    dmodel = three_d // 3
    dh = dmodel // heads
    scale = 1.0 / math.sqrt(dh)
    kernel = _make_attn_kernel(heads, dh, scale, mask is not None)
    in_specs = [pl.BlockSpec((pl.Squeezed(), S, three_d), lambda b: (b, 0, 0))]
    args = [qkv]
    if mask is not None:
        in_specs.append(pl.BlockSpec((S, S), lambda b: (0, 0)))
        args.append(mask)
    return pl.pallas_call(
        kernel,
        out_shape=jax.ShapeDtypeStruct((Bq, S, dmodel), qkv.dtype),
        grid=(Bq,),
        in_specs=in_specs,
        out_specs=pl.BlockSpec((pl.Squeezed(), S, dmodel), lambda b: (b, 0, 0)),
        compiler_params=_PARALLEL_1D,
    )(*args)


def pallas_layernorm(x2d, gamma, beta):
    M, Dm = x2d.shape
    tm, n, pM = _row_plan(M)
    xp = _pad_rows(x2d, pM)
    out = pl.pallas_call(
        _layernorm_kernel,
        out_shape=jax.ShapeDtypeStruct((pM, Dm), x2d.dtype),
        grid=(n,),
        in_specs=[pl.BlockSpec((tm, Dm), lambda i: (i, 0)),
                  pl.BlockSpec((1, Dm), lambda i: (0, 0)),
                  pl.BlockSpec((1, Dm), lambda i: (0, 0))],
        out_specs=pl.BlockSpec((tm, Dm), lambda i: (i, 0)),
        compiler_params=_PARALLEL_1D,
    )(xp, gamma.reshape(1, Dm), beta.reshape(1, Dm))
    return out[:M]


def pallas_batchnorm1d(x2d, gamma, beta, run_mean, run_var, use_batch_stats):
    # TODO(synk): training-mode running-stat updates (momentum) are not modeled; forward
    # output matches PyTorch BatchNorm1d training/eval forward.
    M, Dm = x2d.shape
    vec = pl.BlockSpec((1, Dm), lambda i: (0, 0))
    return pl.pallas_call(
        _make_bn_kernel(use_batch_stats),
        out_shape=jax.ShapeDtypeStruct((M, Dm), jnp.float32),
        grid=(1,),
        in_specs=[pl.BlockSpec((M, Dm), lambda i: (0, 0)), vec, vec, vec, vec],
        out_specs=pl.BlockSpec((M, Dm), lambda i: (0, 0)),
        compiler_params=_ARBITRARY_1D,
    )(x2d, gamma.reshape(1, Dm), beta.reshape(1, Dm),
      run_mean.reshape(1, Dm), run_var.reshape(1, Dm))


# ============================ transformer building blocks =======================
def resblock(x, p, heads, mask):
    """CLIP ResidualAttentionBlock: x += attn(ln1(x)); x += mlp(ln2(x)) — fully fused."""
    Bq, S, Dm = x.shape
    x2 = x.reshape(Bq * S, Dm)
    # fused ln1 + QKV projection
    qkv = pallas_ln_matmul(x2, p["ln1_g"], p["ln1_b"], p["w_qkv"], p["b_qkv"])     # [B*S, 3D]
    # attention (per-head slicing + softmax in-kernel)
    attn = pallas_attention(qkv.reshape(Bq, S, 3 * Dm), heads, mask)                # [B, S, D]
    # out-projection with fused residual
    x2 = pallas_matmul_bias_residual(attn.reshape(Bq * S, Dm), p["w_out"], p["b_out"], x2)
    # fused ln2 + fc1 + QuickGELU + fc2 + residual
    x2 = pallas_ln_mlp_residual(x2, p["ln2_g"], p["ln2_b"],
                                p["w_fc1"], p["b_fc1"], p["w_fc2"], p["b_fc2"])
    return x2.reshape(Bq, S, Dm)


# ================================= image encoder ================================
def image_encoder(x_nchw, cv_embed, p):
    Bq = x_nchw.shape[0]
    x_nchw = x_nchw.astype(ACT_DTYPE)
    # Conv2d(patch, stride=patch, bias=False) expressed as patch-extraction + matmul.
    patches = x_nchw.reshape(Bq, C_IN, IMG // PATCH, PATCH, IMG // PATCH, PATCH)
    patches = patches.transpose(0, 2, 4, 1, 3, 5).reshape(Bq, NP, C_IN * PATCH * PATCH)
    tok = pallas_matmul(patches.reshape(Bq * NP, -1), p["w_patch"]).reshape(Bq, NP, D)
    cls = jnp.broadcast_to(p["cls_token"][None, None, :], (Bq, 1, D))
    x = jnp.concatenate([cls, tok], axis=1) + p["pos_embed"][None]
    if cv_embed is not None:
        x = x.at[:, 0, :].add(cv_embed.astype(x.dtype))     # CLIP-ReID SIE embedding on CLS
    x = pallas_layernorm(x.reshape(Bq * S_IMG, D),
                         p["ln_pre_g"], p["ln_pre_b"]).reshape(Bq, S_IMG, D)
    for l in range(L_IMG - 1):                              # blocks[:L-1]
        x = resblock(x, p["blocks"][l], HEADS, None)        # no mask on the image path
    feats_last = x                                          # like x11 in CLIP-ReID
    x = resblock(x, p["blocks"][L_IMG - 1], HEADS, None)    # last block
    feats = pallas_layernorm(x.reshape(Bq * S_IMG, D),
                             p["ln_post_g"], p["ln_post_b"]).reshape(Bq, S_IMG, D)
    feats_proj = pallas_matmul(feats.reshape(Bq * S_IMG, D), p["proj"]).reshape(Bq, S_IMG, DP)
    return feats_last, feats, feats_proj


# ============================ prompt learner / text encoder =====================
def prompt_learner(label, p):
    b = label.shape[0]
    cls_ctx = p["cls_ctx"][label]                                           # [b, n_cls_ctx, DT]
    prefix = jnp.broadcast_to(p["token_prefix"], (b,) + p["token_prefix"].shape[1:])
    suffix = jnp.broadcast_to(p["token_suffix"], (b,) + p["token_suffix"].shape[1:])
    return jnp.concatenate([prefix, cls_ctx, suffix], axis=1)               # [b, S_T, DT]


def text_encoder(prompts, tokenized_prompts, p):
    Bq, S, Dm = prompts.shape
    x = (prompts + p["pos_embed"][None]).astype(ACT_DTYPE)
    causal = jnp.where(jnp.tril(jnp.ones((S, S), bool)), 0.0, -1e9).astype(jnp.float32)
    for l in range(L_TXT):
        x = resblock(x, p["blocks"][l], HEADS_T, causal)
    x = pallas_layernorm(x.reshape(Bq * S, Dm),
                         p["ln_final_g"], p["ln_final_b"]).reshape(Bq, S, Dm)
    eot = jnp.argmax(tokenized_prompts, axis=-1)                            # EOT position
    eot = jnp.broadcast_to(eot, (Bq,))
    x_eot = x[jnp.arange(Bq), eot]                                          # [B, DT]
    return pallas_matmul(x_eot, p["text_projection"])                       # [B, DP]


# ============================== build_transformer fwd ===========================
def forward(params, x=None, label=None, get_image=False, get_text=False,
            cam_label=None, view_label=None, training=False, neck_feat="before"):
    if get_text:
        prompts = prompt_learner(label, params["text"])
        return text_encoder(prompts, params["text"]["tokenized_prompts"], params["text"])

    if get_image:
        _, _, image_features_proj = image_encoder(x, None, params["visual"])
        return image_features_proj[:, 0]           # ViT-B-16 branch

    # ---- ViT-B-16 branch (RN50 avg_pool branch not exercised with this model name) ----
    if cam_label is not None and view_label is not None:
        cv_embed = SIE_COE * params["cv_embed"][cam_label * VIEW_NUM + view_label]
    elif cam_label is not None:
        cv_embed = SIE_COE * params["cv_embed"][cam_label]
    elif view_label is not None:
        cv_embed = SIE_COE * params["cv_embed"][view_label]
    else:
        cv_embed = None

    feats_last, feats, feats_proj = image_encoder(x, cv_embed, params["visual"])
    img_feature_last = feats_last[:, 0]
    img_feature = feats[:, 0]
    img_feature_proj = feats_proj[:, 0]

    feat = pallas_batchnorm1d(img_feature, params["bn_g"], params["bn_b"],
                              params["bn_mean"], params["bn_var"], use_batch_stats=training)
    feat_proj = pallas_batchnorm1d(img_feature_proj, params["bnp_g"], params["bnp_b"],
                                   params["bnp_mean"], params["bnp_var"], use_batch_stats=training)
    if training:
        cls_score = pallas_matmul(feat, params["classifier_w_t"])            # Linear(bias=False)
        cls_score_proj = pallas_matmul(feat_proj, params["classifier_proj_w_t"])
        return ([cls_score, cls_score_proj],
                [img_feature_last, img_feature, img_feature_proj],
                img_feature_proj)
    elif neck_feat == "after":
        return jnp.concatenate([feat, feat_proj], axis=1)
    else:
        return jnp.concatenate([img_feature, img_feature_proj], axis=1)


# ================================= param init ===================================
def _n(key, shape, std):
    return (std * jax.random.normal(key, shape)).astype(jnp.float32)


def init_block(key, d):
    ks = jax.random.split(key, 4)
    return dict(
        ln1_g=jnp.ones((d,), jnp.float32), ln1_b=jnp.zeros((d,), jnp.float32),
        w_qkv=_n(ks[0], (d, 3 * d), 0.02), b_qkv=jnp.zeros((3 * d,), jnp.float32),
        w_out=_n(ks[1], (d, d), 0.02), b_out=jnp.zeros((d,), jnp.float32),
        ln2_g=jnp.ones((d,), jnp.float32), ln2_b=jnp.zeros((d,), jnp.float32),
        w_fc1=_n(ks[2], (d, 4 * d), 0.02), b_fc1=jnp.zeros((4 * d,), jnp.float32),
        w_fc2=_n(ks[3], (4 * d, d), 0.02), b_fc2=jnp.zeros((d,), jnp.float32),
    )


def _cast_float_tree(tree, dtype):
    return jax.tree_util.tree_map(
        lambda a: a.astype(dtype) if jnp.issubdtype(a.dtype, jnp.floating) else a, tree)


def init_params(key):
    # TODO(synk): real module loads pretrained CLIP weights (load_clip_to_cpu); here we use
    # deterministic synthetic initializers with the same tensor roles/shapes (scaled down).
    kv, kt, kh = jax.random.split(key, 3)
    vks = jax.random.split(kv, 4 + L_IMG)
    visual = dict(
        w_patch=_n(vks[0], (C_IN * PATCH * PATCH, D), 0.02),
        cls_token=_n(vks[1], (D,), 0.02),
        pos_embed=_n(vks[2], (S_IMG, D), 0.02),
        ln_pre_g=jnp.ones((D,), jnp.float32), ln_pre_b=jnp.zeros((D,), jnp.float32),
        blocks=[init_block(vks[4 + l], D) for l in range(L_IMG)],
        ln_post_g=jnp.ones((D,), jnp.float32), ln_post_b=jnp.zeros((D,), jnp.float32),
        proj=_n(vks[3], (D, DP), 0.02),
    )
    tks = jax.random.split(kt, 6 + L_TXT)
    tokenized = jnp.arange(S_T, dtype=jnp.int32)[None, :]
    tokenized = tokenized.at[0, N_CTX + 1 + N_CLS_CTX + 2].set(1000)   # synthetic EOT position
    text = dict(
        token_prefix=_n(tks[0], (1, N_CTX + 1, DT), 0.02),
        token_suffix=_n(tks[1], (1, S_T - (N_CTX + 1) - N_CLS_CTX, DT), 0.02),
        cls_ctx=_n(tks[2], (NUM_CLASSES, N_CLS_CTX, DT), 0.02),          # nn.init.normal_(std=0.02)
        pos_embed=_n(tks[3], (S_T, DT), 0.01),
        blocks=[init_block(tks[6 + l], DT) for l in range(L_TXT)],
        ln_final_g=jnp.ones((DT,), jnp.float32), ln_final_b=jnp.zeros((DT,), jnp.float32),
        text_projection=_n(tks[4], (DT, DP), 0.02),
        tokenized_prompts=tokenized,
    )
    # CLIP backbone stored in bf16 (f32 accumulation happens inside the kernels).
    visual = _cast_float_tree(visual, ACT_DTYPE)
    text = _cast_float_tree(text, ACT_DTYPE)

    hks = jax.random.split(kh, 3)
    head = dict(
        # nn.Linear(..., bias=False).weight ~ N(0, 0.001); stored transposed for x @ W.T
        classifier_w_t=_n(hks[0], (D, NUM_CLASSES), 0.001),
        classifier_proj_w_t=_n(hks[1], (DP, NUM_CLASSES), 0.001),
        # BatchNorm1d after weights_init_kaiming: gamma=1, beta=0; fresh running stats
        bn_g=jnp.ones((D,), jnp.float32), bn_b=jnp.zeros((D,), jnp.float32),
        bn_mean=jnp.zeros((D,), jnp.float32), bn_var=jnp.ones((D,), jnp.float32),
        bnp_g=jnp.ones((DP,), jnp.float32), bnp_b=jnp.zeros((DP,), jnp.float32),
        bnp_mean=jnp.zeros((DP,), jnp.float32), bnp_var=jnp.ones((DP,), jnp.float32),
        cv_embed=_n(hks[2], (CAM_NUM * VIEW_NUM, D), 0.02),              # trunc_normal_(std=0.02)
    )
    return dict(visual=visual, text=text, **head)


# ===================================== main =====================================
if __name__ == "__main__":
    root = jax.random.PRNGKey(0)
    params = init_params(root)
    kx, kl, kc, kv = jax.random.split(jax.random.PRNGKey(0), 4)
    x = jax.random.normal(kx, (B, C_IN, IMG, IMG), jnp.float32)          # NCHW like PyTorch
    label = jax.random.randint(kl, (B,), 0, NUM_CLASSES)
    cam_label = jax.random.randint(kc, (B,), 0, CAM_NUM)
    view_label = jax.random.randint(kv, (B,), 0, VIEW_NUM)

    # eval / inference path (self.training=False, neck_feat='before')
    feats_eval = forward(params, x=x, cam_label=cam_label, view_label=view_label,
                         training=False)
    jax.block_until_ready(feats_eval)
    assert feats_eval.shape == (B, D + DP)

    # training path: ([cls_score, cls_score_proj], [last, feat, feat_proj], feat_proj)
    out_train = forward(params, x=x, cam_label=cam_label, view_label=view_label,
                        training=True)
    jax.block_until_ready(out_train)
    assert out_train[0][0].shape == (B, NUM_CLASSES)
    assert out_train[0][1].shape == (B, NUM_CLASSES)

    # get_image path
    img_proj = forward(params, x=x, get_image=True)
    jax.block_until_ready(img_proj)
    assert img_proj.shape == (B, DP)

    # get_text path (PromptLearner + TextEncoder)
    txt = forward(params, label=label, get_text=True)
    jax.block_until_ready(txt)
    assert txt.shape == (B, DP)

    print("KERNEL_OK")
</pallas_src>

<mosaic_0001>
module attributes {stable_mosaic.version = 11 : i64} {
  func.func @_matmul_kernel(%arg0: i32, %arg1: memref<32x48xbf16, #tpu.memory_space<vmem>>, %arg2: memref<48x64xbf16, #tpu.memory_space<vmem>>, %arg3: memref<32x64xbf16, #tpu.memory_space<vmem>>) attributes {dimension_semantics = [#tpu.dimension_semantics<parallel>], iteration_bounds = array<i64: 1>, scalar_prefetch = 0 : i64, scratch_operands = 0 : i64, tpu.core_type = #tpu.core_type<tc>, window_params = [{transform_indices = @transform_0, window_bounds = array<i64: 32, 48>}, {pipeline_mode = #tpu.pipeline_mode<synchronous>, transform_indices = @transform_1, window_bounds = array<i64: 48, 64>}, {transform_indices = @transform_2, window_bounds = array<i64: 32, 64>}]} {
    %c0 = arith.constant 0 : index
    %c0_0 = arith.constant 0 : index
    %0 = vector.load %arg1[%c0, %c0_0] : memref<32x48xbf16, #tpu.memory_space<vmem>>, vector<32x48xbf16>
    %c0_1 = arith.constant 0 : index
    %c0_2 = arith.constant 0 : index
    %1 = vector.load %arg2[%c0_1, %c0_2] : memref<48x64xbf16, #tpu.memory_space<vmem>>, vector<48x64xbf16>
    %cst = arith.constant dense<0.000000e+00> : vector<32x64xf32>
    %2 = tpu.matmul %0, %1, %cst {dimension_numbers = #tpu.dot_dimension_numbers<[1], [0], [0], [1], [0, 0, 1, 1], [], []>} : vector<32x48xbf16>, vector<48x64xbf16>, vector<32x64xf32> -> vector<32x64xf32>
    %3 = arith.truncf %2 : vector<32x64xf32> to vector<32x64xbf16>
    %c0_3 = arith.constant 0 : index
    %c0_4 = arith.constant 0 : index
    %4 = vector.load %arg3[%c0_3, %c0_4] : memref<32x64xbf16, #tpu.memory_space<vmem>>, vector<32x64xbf16>
    tpu.vector_store %arg3[%c0_3, %c0_4], %3 {strides = array<i32>} : memref<32x64xbf16, #tpu.memory_space<vmem>>, vector<32x64xbf16>,
    return
  }
  func.func @transform_0(%arg0: i32) -> (i32, i32) {
    %c0_i32 = arith.constant 0 : i32
    %c0_i32_0 = arith.constant 0 : i32
    return %arg0, %c0_i32 : i32, i32
  }
  func.func @transform_1(%arg0: i32) -> (i32, i32) {
    %c0_i32 = arith.constant 0 : i32
    %c0_i32_0 = arith.constant 0 : i32
    %c0_i32_1 = arith.constant 0 : i32
    return %c0_i32, %c0_i32_0 : i32, i32
  }
  func.func @transform_2(%arg0: i32) -> (i32, i32) {
    %c0_i32 = arith.constant 0 : i32
    %c0_i32_0 = arith.constant 0 : i32
    return %arg0, %c0_i32 : i32, i32
  }
}

</mosaic_0001>

<bundles_post_ra>
// kernel: tpu_custom_call.1
= control target key start
LH: loop header
LB: loop body
LE: loop exit
PB: predicated region body
PF: predicated region fallthrough
CT: control target
= control target key end

     0   :  { %7 = vsyncpa [#allocation3], 0  ;;  %s318_s0 = inlined_call_operand.hbm [shape: bf16[32,48], index: 0, kind: input, shape index: {}]   ;;  %s319_s1 = inlined_call_operand.hbm [shape: bf16[48,64], index: 1, kind: input, shape index: {}]   ;;  %s320_s2 = inlined_call_operand.hbm [shape: bf16[32,64], index: 2, kind: output, shape index: {}]  }
   0x1   :  { %8 = vsyncpa [#allocation6], 0 }
   0x2   :  { %9 = vsyncpa [#allocation4], 0  ;;  %s280_s9 = smov [#allocation2]  }
   0x3   :  { %s15_s10 = sshll.u32 %s280_s9, 4  ;;  %s16_s10 = int_to_ptr.vmem [resolvable:$true] %s15_s10 }
   0x4   :  { %s222_s11 = scalar_lea.vmem %s16_s10, 256  ;;  %p227_p1 = scmp.lt.s32.totalorder %s16_s10, %s16_s10 }
   0x5   :  { %p223_p0 = scmp.ne.s32.totalorder %s16_s10, %s222_s11  ;;  %p228_p2 = scmp.lt.s32.totalorder %s222_s11, %s222_s11 }
   0x7   :  { %p229_p3 = por %p228_p2, %p227_p1 }
   0x9   :  { %p230_p4 = pnand %p229_p3, %p223_p0 }
   0xb   :  { %233 = shalt.err (!%p230_p4)
}
   0xc   :  { %s281_s12 = smov 64   ;;  %s282_s13 = smov 4  }
   0xd   :  { %21 = dma.hbm_to_vmem [thread:$0]  %s318_s0, 256, %s16_s10, [#allocation3], %s281_s12, %s281_s12, %s282_s13  }
   0xe   :  { %s283_s16 = smov [#allocation5]  }
   0xf   :  { %s27_s17 = sshll.u32 %s283_s16, 4  ;;  %s28_s17 = int_to_ptr.vmem [resolvable:$true] %s27_s17 }
  0x10   :  { %s242_s18 = scalar_lea.vmem %s28_s17, 384  ;;  %p247_p6 = scmp.lt.s32.totalorder %s28_s17, %s28_s17 }
  0x11   :  { %p243_p5 = scmp.ne.s32.totalorder %s28_s17, %s242_s18  ;;  %p248_p7 = scmp.lt.s32.totalorder %s242_s18, %s242_s18 }
  0x13   :  { %p249_p8 = por %p248_p7, %p247_p6 }
  0x15   :  { %p250_p9 = pnand %p249_p8, %p243_p5 }
  0x17   :  { %253 = shalt.err (!%p250_p9)
}
  0x18   :  { %33 = dma.hbm_to_vmem [thread:$0]  %s319_s1, 384, %s28_s17, [#allocation6], %s281_s12, %s281_s12, %s282_s13  }
  0x19   :  { %274 = dma.done.wait [#allocation3], 256  }
  0x1a   :  { %275 = vsyncadd [#allocation3], 4294967040 }
  0x1b   :  { %276 = dma.done.wait [#allocation6], 384  }
  0x1c   :  { %277 = vsyncadd [#allocation6], 4294966912  ;;  %v209_v0 = vld [vmem:[#allocation5 + $0x10] sm:$0xff]   ;;  %v210_v1 = vld [vmem:[#allocation5 + $0x8] sm:$0xff]   ;;  %vm79_vm0 = vcmask 392192   ;;  %vm151_vm1 = vcmask 519168  }
  0x1d   :  { %194 = vmatprep.subr.bf16.mxu0 %v209_v0  ;;  %v212_v2 = vld [vmem:[#allocation2] sm:$0xff]   ;;  %v211_v3 = vld [vmem:[#allocation5] sm:$0xff]   ;;  %v213_v4 = vld [vmem:[#allocation2 + $0x8] sm:$0xff]   ;;  %s284_s0 = smov [#allocation7]  }
  0x1e   :  { %195 = vmatpush3.bf16.msra.mxu0 %v209_v0  ;;  %200 = vmatprep.mubr.msk.bf16.mxu0 %vm79_vm0, %v212_v2  ;;  %s161_s1 = sshll.u32 %s284_s0, 4  ;;  %s162_s1 = int_to_ptr.vmem [resolvable:$true] %s161_s1 }
  0x1f   :  { %196 = vmatprep.subr.bf16.mxu0 %v210_v1  ;;  %s254_s21 = scalar_lea.vmem %s162_s1, 256  ;;  %p259_p11 = scmp.lt.s32.totalorder %s162_s1, %s162_s1 }
  0x20   :  { %p255_p10 = scmp.ne.s32.totalorder %s162_s1, %s254_s21  ;;  %p260_p12 = scmp.lt.s32.totalorder %s254_s21, %s254_s21 }
  0x22   :  { %197 = vmatpush3.bf16.msra.mxu0 %v210_v1  ;;  %p261_p13 = por %p260_p12, %p259_p11 }
  0x23   :  { %198 = vmatprep.subr.bf16.mxu0 %v211_v3 }
  0x24   :  { %p262_p0 = pnand %p261_p13, %p255_p10 }
  0x26   :  { %199 = vmatpush3.bf16.msra.mxu0 %v211_v3 }
  0x29   :  { %201 = vmatmul.mubr.msk.bf16.vlgmr.msra.gmra.mxu0 %vm79_vm0, %v213_v4 }
  0xe9   :  { %v202_v5 = vpop.f32.mrf.mxu0 }
  0xea   :  { %v187_v6 = vpack.c.bf16 %v202_v5, %v202_v5 }
  0xeb   :  { %v120_v7 = vpop.f32.mrf.mxu0 }
  0xec   :  { %154 = vst.msk [vmem:[#allocation7 + $0x8] sm:$0xf] %vm151_vm1, %v187_v6  ;;  %v185_v8 = vpack.c.bf16 %v120_v7, %v120_v7 }
  0xed   :  { %v203_v9 = vpop.f32.mrf.mxu0 }
  0xee   :  { %152 = vst.msk [vmem:[#allocation7] sm:$0xf] %vm151_vm1, %v185_v8  ;;  %v188_v10 = vpack.c.bf16 %v203_v9, %v203_v9 }
  0xef   :  { %v123_v11 = vpop.f32.mrf.mxu0 }
  0xf0   :  { %155 = vst.msk [vmem:[#allocation7 + $0xc] sm:$0xf] %vm151_vm1, %v188_v10  ;;  %v186_v12 = vpack.c.bf16 %v123_v11, %v123_v11 }
  0xf2   :  { %153 = vst.msk [vmem:[#allocation7 + $0x4] sm:$0xf] %vm151_vm1, %v186_v12 }
  0xf3   :  { %265 = shalt.err (!%p262_p0)
}
  0xf4   :  { %167 = dma.vmem_to_hbm [thread:$0]  %s162_s1, 256, %s320_s2, [#allocation4], %s281_s12, %s281_s12, %s282_s13  }
  0xf5   :  { %278 = dma.done.wait [#allocation4], 256  }
  0xf6   :  { %279 = vsyncadd [#allocation4], 4294967040 }
  0xf7   :  { %171 = vsyncpa [#allocation3], 1 }
  0xf8   :  { %172 = vsyncpa [#allocation6], 1 }
  0xf9   :  { %173 = vsyncpa [#allocation4], 1 }

</bundles_post_ra>
